<compile_context>
chip_gen: v7x
topology: tpu7x:2x2x1
jax: 0.10.0
libtpu: 0.0.40
codegen_flags: <defaults>
</compile_context>

<pallas_src>
import functools

import jax
import jax.numpy as jnp
import numpy as np
from jax import lax
from jax.experimental import pallas as pl
from jax.experimental.pallas import tpu as pltpu


def _round_up(v, m):
    return (v + m - 1) // m * m


def _dsc_kernel(x_ref, wdb_ref, wpb_ref, o_ref, *,
                NB, C, Co, Lp, Wp, K, P, GL, use_mxu):
    # x_ref  : (NB*C, TOTAL) guard-padded; row n*C+c = image n of block, chan c
    # wdb_ref: (NB*C, K*K+1) depthwise taps (BN1 scale folded) | folded bias b1
    # wpb_ref: (Co,  C+1)    pointwise weights (BN2 scale folded) | folded b2
    # o_ref  : (NB*Co, Lp)   lane-aligned padded-grid output
    KK = K * K
    wdb = wdb_ref[...]
    wd, b1 = wdb[:, :KK], wdb[:, KK:KK + 1]

    # Depthwise conv: K*K static lane-offset Ref slices, VPU multiply-adds.
    # Accumulator initialised with the first tap (no zeros + extra add).
    acc = None
    for kh in range(K):
        for kw in range(K):
            off = GL + (kh - P) * Wp + (kw - P)              # static lane offset
            xs = x_ref[:, off:off + Lp].astype(jnp.float32)  # (NB*C, Lp)
            tap = wd[:, kh * K + kw:kh * K + kw + 1]         # (NB*C, 1)
            term = xs * tap
            acc = term if acc is None else acc + term

    # Fused BN1 bias + ReLU.
    h1 = jnp.maximum(acc + b1, 0.0)                          # (NB*C, Lp)

    wpb = wpb_ref[...]
    w_pw, b2 = wpb[:, :C], wpb[:, C:C + 1]                   # (Co,C), (Co,1)

    # Pointwise 1x1 conv per image of the block; fused BN2 bias + ReLU;
    # lane-dense stores.
    for n in range(NB):
        h1_n = h1[n * C:(n + 1) * C, :]                      # (C, Lp)
        if use_mxu:
            # Realistic channel counts: MXU dot (C, Co padded to tile outside).
            z = jnp.dot(w_pw, h1_n, preferred_element_type=jnp.float32)
        else:
            # Small-C fallback: C VPU multiply-adds (a CxC contraction is pure
            # MXU fill/drain, keep it off the systolic array).
            z = None
            for c in range(C):
                term = w_pw[:, c:c + 1] * h1_n[c:c + 1, :]   # (Co,1)*(1,Lp)
                z = term if z is None else z + term
        o_ref[n * Co:(n + 1) * Co, :] = (
            jnp.maximum(z + b2, 0.0).astype(o_ref.dtype))


def _choose_images_per_block(N, C, Co):
    """Images per grid step: fill the 8 f32 sublanes; keep blocks (8,128)-legal."""
    NB = max(1, -(-8 // C))
    if -(-N // NB) > 1:
        # Multi-step grid: block sublane counts must be multiples of 8.
        while (NB * C) % 8 or (NB * Co) % 8:
            NB += 1
    return NB


def depthwise_separable_conv(x, params, *, kernel_size=3, padding=1, eps=1e-5,
                             storage_dtype=jnp.float32):
    """x: (N, C_in, H, W) float32.  Returns (N, C_out, H, W) float32.

    storage_dtype: HBM storage dtype for the image slab (use jnp.bfloat16 on
    v6e/v7x to halve DMA bytes; the kernel upcasts on load, f32 accumulate).
    """
    N, C, H, W = x.shape
    K, P = kernel_size, padding
    assert P == (K - 1) // 2, "flat-tap scheme assumes 'same' padding"

    w_dw = params["dw_weight"]      # (C, 1, K, K)
    b_dw = params["dw_bias"]        # (C,)
    g1, be1 = params["bn1_gamma"], params["bn1_beta"]
    m1, v1 = params["bn1_mean"], params["bn1_var"]
    w_pw = params["pw_weight"]      # (Co, C, 1, 1)
    b_pw = params["pw_bias"]        # (Co,)
    g2, be2 = params["bn2_gamma"], params["bn2_beta"]
    m2, v2 = params["bn2_mean"], params["bn2_var"]
    Co = w_pw.shape[0]
    # BN1 is BatchNorm2d(out_channels) applied to an in_channels-wide tensor.
    assert C == Co, "DepthwiseSeparableConv is only valid for C_in == C_out"

    # Fold BN (eval mode) into affine scale/bias fused with the conv weights.
    s1 = g1 / jnp.sqrt(v1 + eps)                       # (C,)
    b1 = (b_dw - m1) * s1 + be1                        # (C,)
    s2 = g2 / jnp.sqrt(v2 + eps)                       # (Co,)
    b2 = (b_pw - m2) * s2 + be2                        # (Co,)
    wd_taps = (w_dw[:, 0] * s1[:, None, None]).reshape(C, K * K)   # (C, K*K)
    wp_eff = w_pw[:, :, 0, 0] * s2[:, None]                        # (Co, C)

    # ---- layout plumbing (no transpose: NCHW reshapes straight to rows) ----
    Hp, Wp = H + 2 * P, W + 2 * P
    L = Hp * Wp                                # flattened padded spatial / image
    Lp = _round_up(L, 128)                     # lane-aligned output width
    guard = max(P * (Wp + 1), 1)               # largest |tap offset|
    GL = guard
    TOTAL = _round_up(GL + Lp + guard, 128)    # lane-aligned input width

    NB = _choose_images_per_block(N, C, Co)    # images per grid step
    N_pad = _round_up(N, NB)
    grid = N_pad // NB
    NBC, NBCo = NB * C, NB * Co

    xp = jnp.pad(x, ((0, N_pad - N), (0, 0), (P, P), (P, P)))   # (N',C,Hp,Wp)
    x_rows = xp.reshape(N_pad * C, L)                           # no transpose
    x_ext = jnp.pad(x_rows, ((0, 0), (GL, TOTAL - GL - L))).astype(storage_dtype)

    # Pack the tiny per-row operands (fewer DMAs / VMEM tiles).
    wdb = jnp.tile(
        jnp.concatenate([wd_taps, b1.reshape(C, 1)], axis=1), (NB, 1)
    ).astype(jnp.float32)                                       # (NB*C, K*K+1)
    wpb = jnp.concatenate([wp_eff, b2.reshape(Co, 1)], axis=1).astype(jnp.float32)

    use_mxu = (C >= 32 and Co >= 32)
    kernel = functools.partial(_dsc_kernel, NB=NB, C=C, Co=Co, Lp=Lp, Wp=Wp,
                               K=K, P=P, GL=GL, use_mxu=use_mxu)

    # VMEM budget: 2x double-buffering + headroom for acc/h1/z; cap at 64 MiB
    # so the same tiling stays legal on v7x.
    itemsize = jnp.dtype(storage_dtype).itemsize
    block_bytes = NBC * TOTAL * itemsize + NBCo * Lp * 4
    vmem_limit = int(min(64 << 20, max(4 << 20, 6 * block_bytes)))

    out_flat = pl.pallas_call(
        kernel,
        out_shape=jax.ShapeDtypeStruct((N_pad * Co, Lp), jnp.float32),
        grid=(grid,),
        in_specs=[
            pl.BlockSpec((NBC, TOTAL), lambda i: (i, 0)),
            pl.BlockSpec((NBC, K * K + 1), lambda i: (0, 0)),
            pl.BlockSpec((Co, C + 1), lambda i: (0, 0)),
        ],
        out_specs=pl.BlockSpec((NBCo, Lp), lambda i: (i, 0)),
        compiler_params=pltpu.CompilerParams(
            dimension_semantics=("parallel",),
            vmem_limit_bytes=vmem_limit),
    )(x_ext, wdb, wpb)

    # Extract the valid interior and drop padded images (cheap XLA slicing).
    out = out_flat[:N * Co, :L].reshape(N, Co, Hp, Wp)[:, :, P:P + H, P:P + W]
    return out


def _reference(x, params, *, kernel_size=3, padding=1, eps=1e-5):
    """Pure-JAX reference (eval-mode BN) using lax conv ops, NCHW."""
    C = x.shape[1]
    wd = params["dw_weight"]
    y = lax.conv_general_dilated(
        x, wd, window_strides=(1, 1), padding=[(padding, padding)] * 2,
        dimension_numbers=("NCHW", "OIHW", "NCHW"), feature_group_count=C)
    y = y + params["dw_bias"][None, :, None, None]
    s1 = params["bn1_gamma"] / jnp.sqrt(params["bn1_var"] + eps)
    y = (y - params["bn1_mean"][None, :, None, None]) * s1[None, :, None, None] \
        + params["bn1_beta"][None, :, None, None]
    y = jnp.maximum(y, 0.0)
    z = lax.conv_general_dilated(
        y, params["pw_weight"], window_strides=(1, 1), padding=[(0, 0)] * 2,
        dimension_numbers=("NCHW", "OIHW", "NCHW"))
    z = z + params["pw_bias"][None, :, None, None]
    s2 = params["bn2_gamma"] / jnp.sqrt(params["bn2_var"] + eps)
    z = (z - params["bn2_mean"][None, :, None, None]) * s2[None, :, None, None] \
        + params["bn2_beta"][None, :, None, None]
    return jnp.maximum(z, 0.0)


def _init_params(key, in_channels, out_channels, kernel_size=3):
    ks = jax.random.split(key, 10)
    C, Co, K = in_channels, out_channels, kernel_size
    return {
        "dw_weight": 0.3 * jax.random.normal(ks[0], (C, 1, K, K), jnp.float32),
        "dw_bias": 0.1 * jax.random.normal(ks[1], (C,), jnp.float32),
        "bn1_gamma": 1.0 + 0.1 * jax.random.normal(ks[2], (Co,), jnp.float32),
        "bn1_beta": 0.1 * jax.random.normal(ks[3], (Co,), jnp.float32),
        "bn1_mean": 0.05 * jax.random.normal(ks[4], (Co,), jnp.float32),
        "bn1_var": 1.0 + 0.1 * jax.nn.softplus(
            jax.random.normal(ks[5], (Co,), jnp.float32)),
        "pw_weight": 0.3 * jax.random.normal(ks[6], (Co, C, 1, 1), jnp.float32),
        "pw_bias": 0.1 * jax.random.normal(ks[7], (Co,), jnp.float32),
        "bn2_gamma": 1.0 + 0.1 * jax.random.normal(ks[8], (Co,), jnp.float32),
        "bn2_beta": 0.1 * jax.random.normal(ks[9], (Co,), jnp.float32),
        "bn2_mean": jnp.zeros((Co,), jnp.float32),
        "bn2_var": jnp.ones((Co,), jnp.float32),
    }


if __name__ == "__main__":
    key = jax.random.PRNGKey(0)
    k_x, k_p = jax.random.split(key)

    N, C_in, C_out, H, W = 2, 4, 4, 16, 16   # C_in == C_out (see NOTE above)
    x = jax.random.normal(k_x, (N, C_in, H, W), jnp.float32)
    params = _init_params(k_p, C_in, C_out)

    dsc = jax.jit(lambda x, p: depthwise_separable_conv(x, p))
    out = jax.block_until_ready(dsc(x, params))

    ref = jax.block_until_ready(_reference(x, params))
    np.testing.assert_allclose(np.asarray(out), np.asarray(ref),
                               rtol=1e-4, atol=1e-4)
    print("KERNEL_OK")
</pallas_src>

<mosaic_0001>
module attributes {stable_mosaic.version = 11 : i64} {
  func.func @_dsc_kernel(%arg0: i32, %arg1: memref<8x512xf32, #tpu.memory_space<vmem>>, %arg2: memref<8x10xf32, #tpu.memory_space<vmem>>, %arg3: memref<4x5xf32, #tpu.memory_space<vmem>>, %arg4: memref<8x384xf32, #tpu.memory_space<vmem>>) attributes {dimension_semantics = [#tpu.dimension_semantics<parallel>], iteration_bounds = array<i64: 1>, scalar_prefetch = 0 : i64, scratch_operands = 0 : i64, tpu.core_type = #tpu.core_type<tc>, window_params = [{transform_indices = @transform_0, window_bounds = array<i64: 8, 512>}, {pipeline_mode = #tpu.pipeline_mode<synchronous>, transform_indices = @transform_1, window_bounds = array<i64: 8, 10>}, {pipeline_mode = #tpu.pipeline_mode<synchronous>, transform_indices = @transform_2, window_bounds = array<i64: 4, 5>}, {transform_indices = @transform_3, window_bounds = array<i64: 8, 384>}]} {
    %c0 = arith.constant 0 : index
    %c0_0 = arith.constant 0 : index
    %0 = vector.load %arg2[%c0, %c0_0] : memref<8x10xf32, #tpu.memory_space<vmem>>, vector<8x10xf32>
    %1 = vector.extract_strided_slice %0 {offsets = [0, 0], sizes = [8, 9], strides = [1, 1]} : vector<8x10xf32> to vector<8x9xf32>
    %2 = vector.extract_strided_slice %0 {offsets = [0, 9], sizes = [8, 1], strides = [1, 1]} : vector<8x10xf32> to vector<8x1xf32>
    %c0_1 = arith.constant 0 : index
    %c0_2 = arith.constant 0 : index
    %3 = vector.load %arg1[%c0_1, %c0_2] : memref<8x512xf32, #tpu.memory_space<vmem>>, vector<8x384xf32>
    %4 = vector.extract_strided_slice %1 {offsets = [0, 0], sizes = [8, 1], strides = [1, 1]} : vector<8x9xf32> to vector<8x1xf32>
    %5 = vector.broadcast %4 : vector<8x1xf32> to vector<8x384xf32>
    %6 = arith.mulf %3, %5 : vector<8x384xf32>
    %c0_3 = arith.constant 0 : index
    %c1 = arith.constant 1 : index
    %7 = vector.load %arg1[%c0_3, %c1] : memref<8x512xf32, #tpu.memory_space<vmem>>, vector<8x384xf32>
    %8 = vector.extract_strided_slice %1 {offsets = [0, 1], sizes = [8, 1], strides = [1, 1]} : vector<8x9xf32> to vector<8x1xf32>
    %9 = vector.broadcast %8 : vector<8x1xf32> to vector<8x384xf32>
    %10 = arith.mulf %7, %9 : vector<8x384xf32>
    %11 = arith.addf %6, %10 : vector<8x384xf32>
    %c0_4 = arith.constant 0 : index
    %c2 = arith.constant 2 : index
    %12 = vector.load %arg1[%c0_4, %c2] : memref<8x512xf32, #tpu.memory_space<vmem>>, vector<8x384xf32>
    %13 = vector.extract_strided_slice %1 {offsets = [0, 2], sizes = [8, 1], strides = [1, 1]} : vector<8x9xf32> to vector<8x1xf32>
    %14 = vector.broadcast %13 : vector<8x1xf32> to vector<8x384xf32>
    %15 = arith.mulf %12, %14 : vector<8x384xf32>
    %16 = arith.addf %11, %15 : vector<8x384xf32>
    %c0_5 = arith.constant 0 : index
    %c18 = arith.constant 18 : index
    %17 = vector.load %arg1[%c0_5, %c18] : memref<8x512xf32, #tpu.memory_space<vmem>>, vector<8x384xf32>
    %18 = vector.extract_strided_slice %1 {offsets = [0, 3], sizes = [8, 1], strides = [1, 1]} : vector<8x9xf32> to vector<8x1xf32>
    %19 = vector.broadcast %18 : vector<8x1xf32> to vector<8x384xf32>
    %20 = arith.mulf %17, %19 : vector<8x384xf32>
    %21 = arith.addf %16, %20 : vector<8x384xf32>
    %c0_6 = arith.constant 0 : index
    %c19 = arith.constant 19 : index
    %22 = vector.load %arg1[%c0_6, %c19] : memref<8x512xf32, #tpu.memory_space<vmem>>, vector<8x384xf32>
    %23 = vector.extract_strided_slice %1 {offsets = [0, 4], sizes = [8, 1], strides = [1, 1]} : vector<8x9xf32> to vector<8x1xf32>
    %24 = vector.broadcast %23 : vector<8x1xf32> to vector<8x384xf32>
    %25 = arith.mulf %22, %24 : vector<8x384xf32>
    %26 = arith.addf %21, %25 : vector<8x384xf32>
    %c0_7 = arith.constant 0 : index
    %c20 = arith.constant 20 : index
    %27 = vector.load %arg1[%c0_7, %c20] : memref<8x512xf32, #tpu.memory_space<vmem>>, vector<8x384xf32>
    %28 = vector.extract_strided_slice %1 {offsets = [0, 5], sizes = [8, 1], strides = [1, 1]} : vector<8x9xf32> to vector<8x1xf32>
    %29 = vector.broadcast %28 : vector<8x1xf32> to vector<8x384xf32>
    %30 = arith.mulf %27, %29 : vector<8x384xf32>
    %31 = arith.addf %26, %30 : vector<8x384xf32>
    %c0_8 = arith.constant 0 : index
    %c36 = arith.constant 36 : index
    %32 = vector.load %arg1[%c0_8, %c36] : memref<8x512xf32, #tpu.memory_space<vmem>>, vector<8x384xf32>
    %33 = vector.extract_strided_slice %1 {offsets = [0, 6], sizes = [8, 1], strides = [1, 1]} : vector<8x9xf32> to vector<8x1xf32>
    %34 = vector.broadcast %33 : vector<8x1xf32> to vector<8x384xf32>
    %35 = arith.mulf %32, %34 : vector<8x384xf32>
    %36 = arith.addf %31, %35 : vector<8x384xf32>
    %c0_9 = arith.constant 0 : index
    %c37 = arith.constant 37 : index
    %37 = vector.load %arg1[%c0_9, %c37] : memref<8x512xf32, #tpu.memory_space<vmem>>, vector<8x384xf32>
    %38 = vector.extract_strided_slice %1 {offsets = [0, 7], sizes = [8, 1], strides = [1, 1]} : vector<8x9xf32> to vector<8x1xf32>
    %39 = vector.broadcast %38 : vector<8x1xf32> to vector<8x384xf32>
    %40 = arith.mulf %37, %39 : vector<8x384xf32>
    %41 = arith.addf %36, %40 : vector<8x384xf32>
    %c0_10 = arith.constant 0 : index
    %c38 = arith.constant 38 : index
    %42 = vector.load %arg1[%c0_10, %c38] : memref<8x512xf32, #tpu.memory_space<vmem>>, vector<8x384xf32>
    %43 = vector.extract_strided_slice %1 {offsets = [0, 8], sizes = [8, 1], strides = [1, 1]} : vector<8x9xf32> to vector<8x1xf32>
    %44 = vector.broadcast %43 : vector<8x1xf32> to vector<8x384xf32>
    %45 = arith.mulf %42, %44 : vector<8x384xf32>
    %46 = arith.addf %41, %45 : vector<8x384xf32>
    %47 = vector.broadcast %2 : vector<8x1xf32> to vector<8x384xf32>
    %48 = arith.addf %46, %47 : vector<8x384xf32>
    %cst = arith.constant 0.000000e+00 : f32
    %49 = vector.broadcast %cst : f32 to vector<8x384xf32>
    %50 = arith.maximumf %48, %49 : vector<8x384xf32>
    %c0_11 = arith.constant 0 : index
    %c0_12 = arith.constant 0 : index
    %51 = vector.load %arg3[%c0_11, %c0_12] : memref<4x5xf32, #tpu.memory_space<vmem>>, vector<4x5xf32>
    %52 = vector.extract_strided_slice %51 {offsets = [0, 0], sizes = [4, 4], strides = [1, 1]} : vector<4x5xf32> to vector<4x4xf32>
    %53 = vector.extract_strided_slice %51 {offsets = [0, 4], sizes = [4, 1], strides = [1, 1]} : vector<4x5xf32> to vector<4x1xf32>
    %54 = vector.extract_strided_slice %50 {offsets = [0, 0], sizes = [4, 384], strides = [1, 1]} : vector<8x384xf32> to vector<4x384xf32>
    %55 = vector.extract_strided_slice %52 {offsets = [0, 0], sizes = [4, 1], strides = [1, 1]} : vector<4x4xf32> to vector<4x1xf32>
    %56 = vector.extract_strided_slice %54 {offsets = [0, 0], sizes = [1, 384], strides = [1, 1]} : vector<4x384xf32> to vector<1x384xf32>
    %57 = vector.broadcast %55 : vector<4x1xf32> to vector<4x384xf32>
    %58 = vector.broadcast %56 : vector<1x384xf32> to vector<4x384xf32>
    %59 = arith.mulf %57, %58 : vector<4x384xf32>
    %60 = vector.extract_strided_slice %52 {offsets = [0, 1], sizes = [4, 1], strides = [1, 1]} : vector<4x4xf32> to vector<4x1xf32>
    %61 = vector.extract_strided_slice %54 {offsets = [1, 0], sizes = [1, 384], strides = [1, 1]} : vector<4x384xf32> to vector<1x384xf32>
    %62 = vector.broadcast %60 : vector<4x1xf32> to vector<4x384xf32>
    %63 = vector.broadcast %61 : vector<1x384xf32> to vector<4x384xf32>
    %64 = arith.mulf %62, %63 : vector<4x384xf32>
    %65 = arith.addf %59, %64 : vector<4x384xf32>
    %66 = vector.extract_strided_slice %52 {offsets = [0, 2], sizes = [4, 1], strides = [1, 1]} : vector<4x4xf32> to vector<4x1xf32>
    %67 = vector.extract_strided_slice %54 {offsets = [2, 0], sizes = [1, 384], strides = [1, 1]} : vector<4x384xf32> to vector<1x384xf32>
    %68 = vector.broadcast %66 : vector<4x1xf32> to vector<4x384xf32>
    %69 = vector.broadcast %67 : vector<1x384xf32> to vector<4x384xf32>
    %70 = arith.mulf %68, %69 : vector<4x384xf32>
    %71 = arith.addf %65, %70 : vector<4x384xf32>
    %72 = vector.extract_strided_slice %52 {offsets = [0, 3], sizes = [4, 1], strides = [1, 1]} : vector<4x4xf32> to vector<4x1xf32>
    %73 = vector.extract_strided_slice %54 {offsets = [3, 0], sizes = [1, 384], strides = [1, 1]} : vector<4x384xf32> to vector<1x384xf32>
    %74 = vector.broadcast %72 : vector<4x1xf32> to vector<4x384xf32>
    %75 = vector.broadcast %73 : vector<1x384xf32> to vector<4x384xf32>
    %76 = arith.mulf %74, %75 : vector<4x384xf32>
    %77 = arith.addf %71, %76 : vector<4x384xf32>
    %78 = vector.broadcast %53 : vector<4x1xf32> to vector<4x384xf32>
    %79 = arith.addf %77, %78 : vector<4x384xf32>
    %cst_13 = arith.constant 0.000000e+00 : f32
    %80 = vector.broadcast %cst_13 : f32 to vector<4x384xf32>
    %81 = arith.maximumf %79, %80 : vector<4x384xf32>
    %c0_14 = arith.constant 0 : index
    %c0_15 = arith.constant 0 : index
    %82 = vector.load %arg4[%c0_14, %c0_15] : memref<8x384xf32, #tpu.memory_space<vmem>>, vector<4x384xf32>
    tpu.vector_store %arg4[%c0_14, %c0_15], %81 {strides = array<i32>} : memref<8x384xf32, #tpu.memory_space<vmem>>, vector<4x384xf32>,
    %83 = vector.extract_strided_slice %50 {offsets = [4, 0], sizes = [4, 384], strides = [1, 1]} : vector<8x384xf32> to vector<4x384xf32>
    %84 = vector.extract_strided_slice %52 {offsets = [0, 0], sizes = [4, 1], strides = [1, 1]} : vector<4x4xf32> to vector<4x1xf32>
    %85 = vector.extract_strided_slice %83 {offsets = [0, 0], sizes = [1, 384], strides = [1, 1]} : vector<4x384xf32> to vector<1x384xf32>
    %86 = vector.broadcast %84 : vector<4x1xf32> to vector<4x384xf32>
    %87 = vector.broadcast %85 : vector<1x384xf32> to vector<4x384xf32>
    %88 = arith.mulf %86, %87 : vector<4x384xf32>
    %89 = vector.extract_strided_slice %52 {offsets = [0, 1], sizes = [4, 1], strides = [1, 1]} : vector<4x4xf32> to vector<4x1xf32>
    %90 = vector.extract_strided_slice %83 {offsets = [1, 0], sizes = [1, 384], strides = [1, 1]} : vector<4x384xf32> to vector<1x384xf32>
    %91 = vector.broadcast %89 : vector<4x1xf32> to vector<4x384xf32>
    %92 = vector.broadcast %90 : vector<1x384xf32> to vector<4x384xf32>
    %93 = arith.mulf %91, %92 : vector<4x384xf32>
    %94 = arith.addf %88, %93 : vector<4x384xf32>
    %95 = vector.extract_strided_slice %52 {offsets = [0, 2], sizes = [4, 1], strides = [1, 1]} : vector<4x4xf32> to vector<4x1xf32>
    %96 = vector.extract_strided_slice %83 {offsets = [2, 0], sizes = [1, 384], strides = [1, 1]} : vector<4x384xf32> to vector<1x384xf32>
    %97 = vector.broadcast %95 : vector<4x1xf32> to vector<4x384xf32>
    %98 = vector.broadcast %96 : vector<1x384xf32> to vector<4x384xf32>
    %99 = arith.mulf %97, %98 : vector<4x384xf32>
    %100 = arith.addf %94, %99 : vector<4x384xf32>
    %101 = vector.extract_strided_slice %52 {offsets = [0, 3], sizes = [4, 1], strides = [1, 1]} : vector<4x4xf32> to vector<4x1xf32>
    %102 = vector.extract_strided_slice %83 {offsets = [3, 0], sizes = [1, 384], strides = [1, 1]} : vector<4x384xf32> to vector<1x384xf32>
    %103 = vector.broadcast %101 : vector<4x1xf32> to vector<4x384xf32>
    %104 = vector.broadcast %102 : vector<1x384xf32> to vector<4x384xf32>
    %105 = arith.mulf %103, %104 : vector<4x384xf32>
    %106 = arith.addf %100, %105 : vector<4x384xf32>
    %107 = vector.broadcast %53 : vector<4x1xf32> to vector<4x384xf32>
    %108 = arith.addf %106, %107 : vector<4x384xf32>
    %cst_16 = arith.constant 0.000000e+00 : f32
    %109 = vector.broadcast %cst_16 : f32 to vector<4x384xf32>
    %110 = arith.maximumf %108, %109 : vector<4x384xf32>
    %c4 = arith.constant 4 : index
    %c0_17 = arith.constant 0 : index
    %111 = vector.load %arg4[%c4, %c0_17] : memref<8x384xf32, #tpu.memory_space<vmem>>, vector<4x384xf32>
    tpu.vector_store %arg4[%c4, %c0_17], %110 {strides = array<i32>} : memref<8x384xf32, #tpu.memory_space<vmem>>, vector<4x384xf32>,
    return
  }
  func.func @transform_0(%arg0: i32) -> (i32, i32) {
    %c0_i32 = arith.constant 0 : i32
    %c0_i32_0 = arith.constant 0 : i32
    return %arg0, %c0_i32 : i32, i32
  }
  func.func @transform_1(%arg0: i32) -> (i32, i32) {
    %c0_i32 = arith.constant 0 : i32
    %c0_i32_0 = arith.constant 0 : i32
    %c0_i32_1 = arith.constant 0 : i32
    return %c0_i32, %c0_i32_0 : i32, i32
  }
  func.func @transform_2(%arg0: i32) -> (i32, i32) {
    %c0_i32 = arith.constant 0 : i32
    %c0_i32_0 = arith.constant 0 : i32
    %c0_i32_1 = arith.constant 0 : i32
    return %c0_i32, %c0_i32_0 : i32, i32
  }
  func.func @transform_3(%arg0: i32) -> (i32, i32) {
    %c0_i32 = arith.constant 0 : i32
    %c0_i32_0 = arith.constant 0 : i32
    return %arg0, %c0_i32 : i32, i32
  }
}

</mosaic_0001>

<bundles_post_ra>
// kernel: _lambda_.1
= control target key start
LH: loop header
LB: loop body
LE: loop exit
PB: predicated region body
PF: predicated region fallthrough
CT: control target
= control target key end

     0   :  { %v504_v0 = vmov 1   ;;  %v505_v2 = vmov 3   ;;  %v506_v3 = vmov 2   ;;  %v507_v4 = vmov 4   ;;  %s514_s19 = smov 127   ;;  %s515_s22 = smov 126   ;;  %s784_s1 = inlined_call_operand.vmem [shape: f32[8,10], index: 1, kind: input, shape index: {}]   ;;  %s785_s0 = inlined_call_operand.vmem [shape: f32[8,512], index: 0, kind: input, shape index: {}]   ;;  %s786_s2 = inlined_call_operand.vmem [shape: f32[4,5], index: 2, kind: input, shape index: {}]   ;;  %s787_s3 = inlined_call_operand.vmem [shape: f32[8,384], index: 3, kind: output, shape index: {}]  }
   0x1   :  { %489 = vset.pattern.permute.xlu0 %v504_v0  ;;  %v14_v1 = vld [vmem:[%s784_s1] sm:$0xff]  ;;  %491 = vset.pattern.permute.xlu1 %v505_v2  ;;  %v508_v5 = vmov 5   ;;  %v509_v6 = vmov 6   ;;  %v510_v7 = vmov 7   ;;  %v511_v8 = vmov 9   ;;  %v551_v11 = vld [vmem:[%s785_s0 + $0x10] sm:$0xff] }
   0x2   :  { %31 = vperm.xlu0 %489, %v14_v1   ;;  %91 = vperm.xlu1 %491, %v14_v1   ;;  %v512_v9 = vmov 8   ;;  %v513_v10 = vmov 0   ;;  %v556_v12 = vld [vmem:[%s785_s0] sm:$0xff]  ;;  %v563_v16 = vld [vmem:[%s785_s0 + $0x8] sm:$0xff]  ;;  %v570_v20 = vld [vmem:[%s785_s0 + $0x18] sm:$0xff]  ;;  %s516_s23 = smov 110  }
   0x3   :  { %s517_s0 = smov 109   ;;  %s518_s24 = smov 108   ;;  %v280_v52 = vld [vmem:[%s786_s2] sm:$0xf]  ;;  %vm50_vm0 = vcmask 1039360   ;;  %vm80_vm1 = vcmask 1031168  }
   0x4   :  { %s519_s25 = smov 92   ;;  %s520_s26 = smov 91   ;;  %vm110_vm2 = vcmask 900096   ;;  %vm140_vm3 = vcmask 891904   ;;  %vm170_vm4 = vcmask 883712   ;;  %vm200_vm5 = vcmask 752640  }
   0x5   :  { %s521_s27 = smov 90   ;;  %vm230_vm6 = vcmask 744448   ;;  %vm260_vm7 = vcmask 736256  }
   0x6   :  { %490 = vset.pattern.permute.xlu0 %v506_v3  ;;  %492 = vset.pattern.permute.xlu1 %v507_v4 }
   0x7   :  { %61 = vperm.xlu0 %490, %v14_v1   ;;  %121 = vperm.xlu1 %492, %v14_v1  }
   0xb   :  { %493 = vset.pattern.permute.xlu1 %v508_v5  ;;  %494 = vset.pattern.permute.xlu0 %v509_v6 }
   0xc   :  { %151 = vperm.xlu1 %493, %v14_v1   ;;  %181 = vperm.xlu0 %494, %v14_v1  }
  0x10   :  { %495 = vset.pattern.permute.xlu1 %v510_v7  ;;  %497 = vset.pattern.permute.xlu0 %v511_v8 }
  0x11   :  { %211 = vperm.xlu1 %495, %v14_v1   ;;  %271 = vperm.xlu0 %497, %v14_v1  }
  0x15   :  { %496 = vset.pattern.permute.xlu1 %v512_v9  ;;  %498 = vset.pattern.permute.xlu0 %v513_v10 }
  0x16   :  { %241 = vperm.xlu1 %496, %v14_v1   ;;  %20 = vperm.xlu0 %498, %v14_v1  }
  0x1a   :  { %499 = vset.pattern.permute.xlu1 %v504_v0 }
  0x81   :  { %v32_v13 = vpop.permute.xlu0 %31  ;;  %v92_v23 = vpop.permute.xlu1 %91 }
  0x82   :  { %v36_v14 = vmul.f32 %v32_v13, %v551_v11  ;;  %v34_v15 = vmul.f32 %v32_v13, %v556_v12  ;;  %v35_v18 = vmul.f32 %v32_v13, %v563_v16  ;;  %v37_v22 = vmul.f32 %v32_v13, %v570_v20 }
  0x83   :  { %v94_v25 = vmul.f32 %v92_v23, %v556_v12  ;;  %v96_v26 = vmul.f32 %v92_v23, %v551_v11  ;;  %v95_v29 = vmul.f32 %v92_v23, %v563_v16  ;;  %v97_v32 = vmul.f32 %v92_v23, %v570_v20 }
  0x84   :  { %46 = vrot.lane.b32.xlu0 %v36_v14, %s514_s19  ;;  %42 = vrot.lane.b32.xlu1 %v34_v15, %s514_s19 }
  0x86   :  { %v62_v17 = vpop.permute.xlu0 %61  ;;  %v122_v28 = vpop.permute.xlu1 %121 }
  0x87   :  { %v64_v19 = vmul.f32 %v62_v17, %v556_v12  ;;  %v66_v21 = vmul.f32 %v62_v17, %v551_v11  ;;  %v65_v24 = vmul.f32 %v62_v17, %v563_v16  ;;  %v67_v27 = vmul.f32 %v62_v17, %v570_v20 }
  0x88   :  { %44 = vrot.lane.b32.xlu1 %v35_v18, %s514_s19  ;;  %v124_v30 = vmul.f32 %v122_v28, %v556_v12  ;;  %v126_v31 = vmul.f32 %v122_v28, %v551_v11  ;;  %v125_v34 = vmul.f32 %v122_v28, %v563_v16  ;;  %v127_v37 = vmul.f32 %v122_v28, %v570_v20 }
  0x89   :  { %72 = vrot.lane.b32.xlu0 %v64_v19, %s515_s22 }
  0x8b   :  { %v152_v33 = vpop.permute.xlu1 %151  ;;  %v182_v38 = vpop.permute.xlu0 %181 }
  0x8c   :  { %48 = vrot.lane.b32.xlu1 %v37_v22, %s514_s19  ;;  %v154_v35 = vmul.f32 %v152_v33, %v556_v12  ;;  %v156_v36 = vmul.f32 %v152_v33, %v551_v11  ;;  %v155_v39 = vmul.f32 %v152_v33, %v563_v16  ;;  %v184_v40 = vmul.f32 %v182_v38, %v556_v12 }
  0x8d   :  { %76 = vrot.lane.b32.xlu0 %v66_v21, %s515_s22  ;;  %v186_v42 = vmul.f32 %v182_v38, %v551_v11  ;;  %v157_v43 = vmul.f32 %v152_v33, %v570_v20  ;;  %v185_v44 = vmul.f32 %v182_v38, %v563_v16  ;;  %v187_v48 = vmul.f32 %v182_v38, %v570_v20 }
  0x90   :  { %74 = vrot.lane.b32.xlu1 %v65_v24, %s515_s22  ;;  %v212_v41 = vpop.permute.xlu1 %211  ;;  %v607_v56 = vpop.permute.xlu0 %271 }
  0x91   :  { %102 = vrot.lane.b32.xlu0 %v94_v25, %s516_s23  ;;  %v216_v45 = vmul.f32 %v212_v41, %v551_v11  ;;  %v214_v49 = vmul.f32 %v212_v41, %v556_v12  ;;  %v215_v51 = vmul.f32 %v212_v41, %v563_v16  ;;  %v217_v53 = vmul.f32 %v212_v41, %v570_v20 }
  0x94   :  { %78 = vrot.lane.b32.xlu1 %v67_v27, %s515_s22 }
  0x95   :  { %106 = vrot.lane.b32.xlu0 %v96_v26, %s516_s23  ;;  %v242_v46 = vpop.permute.xlu1 %241  ;;  %v609_v57 = vpop.permute.xlu0 %20 }
  0x96   :  { %v244_v47 = vmul.f32 %v242_v46, %v556_v12  ;;  %v246_v50 = vmul.f32 %v242_v46, %v551_v11  ;;  %v245_v54 = vmul.f32 %v242_v46, %v563_v16  ;;  %v247_v55 = vmul.f32 %v242_v46, %v570_v20 }
  0x97   :  { %v23_v21 = vmul.f32 %v556_v12, %v609_v57  ;;  %v24_v22 = vmul.f32 %v563_v16, %v609_v57 }
  0x98   :  { %104 = vrot.lane.b32.xlu1 %v95_v29, %s516_s23 }
  0x99   :  { %132 = vrot.lane.b32.xlu0 %v124_v30, %s517_s0 }
  0x9c   :  { %108 = vrot.lane.b32.xlu1 %v97_v32, %s516_s23 }
  0x9d   :  { %136 = vrot.lane.b32.xlu0 %v126_v31, %s517_s0 }
  0xa0   :  { %134 = vrot.lane.b32.xlu1 %v125_v34, %s517_s0 }
  0xa1   :  { %162 = vrot.lane.b32.xlu0 %v154_v35, %s518_s24 }
  0xa4   :  { %138 = vrot.lane.b32.xlu1 %v127_v37, %s517_s0 }
  0xa5   :  { %166 = vrot.lane.b32.xlu0 %v156_v36, %s518_s24 }
  0xa8   :  { %164 = vrot.lane.b32.xlu1 %v155_v39, %s518_s24 }
  0xa9   :  { %192 = vrot.lane.b32.xlu0 %v184_v40, %s519_s25 }
  0xac   :  { %168 = vrot.lane.b32.xlu1 %v157_v43, %s518_s24 }
  0xad   :  { %196 = vrot.lane.b32.xlu0 %v186_v42, %s519_s25 }
  0xb0   :  { %194 = vrot.lane.b32.xlu1 %v185_v44, %s519_s25 }
  0xb1   :  { %226 = vrot.lane.b32.xlu0 %v216_v45, %s520_s26 }
  0xb4   :  { %198 = vrot.lane.b32.xlu1 %v187_v48, %s519_s25 }
  0xb5   :  { %252 = vrot.lane.b32.xlu0 %v244_v47, %s521_s27 }
  0xb8   :  { %222 = vrot.lane.b32.xlu1 %v214_v49, %s520_s26 }
  0xb9   :  { %256 = vrot.lane.b32.xlu0 %v246_v50, %s521_s27 }
  0xbc   :  { %224 = vrot.lane.b32.xlu1 %v215_v51, %s520_s26 }
  0xbd   :  { %283 = vperm.xlu0 %498, %v280_v52  }
  0xc0   :  { %228 = vrot.lane.b32.xlu1 %v217_v53, %s520_s26 }
  0xc1   :  { %501 = vset.pattern.permute.xlu0 %v505_v2 }
  0xc2   :  { %346 = vperm.xlu0 %501, %v280_v52  }
  0xc4   :  { %254 = vrot.lane.b32.xlu1 %v245_v54, %s521_s27 }
  0xc6   :  { %503 = vset.pattern.permute.xlu0 %v507_v4 }
  0xc8   :  { %302 = vperm.xlu1 %499, %v280_v52  }
  0xcc   :  { %258 = vrot.lane.b32.xlu1 %v247_v55, %s521_s27 }
  0xcd   :  { %500 = vset.pattern.permute.xlu1 %v506_v3 }
  0xd0   :  { %324 = vperm.xlu1 %500, %v280_v52  }
  0xd4   :  { %502 = vset.pattern.permute.xlu1 %v507_v4 }
  0xd5   :  { %368 = vperm.xlu1 %502, %v280_v52  }
  0xf6   :  { %v43_v58 = vpop.permute.xlu1 %42  ;;  %v611_v59 = vpop.permute.xlu0 %46 }
  0xfa   :  { %v45_v60 = vpop.permute.xlu1 %44 }
  0xfb   :  { %v73_v61 = vpop.permute.xlu0 %72  ;;  %v51_v24 = vsel %vm50_vm0, %v43_v58, %v45_v60  ;;  %v52_v25 = vsel %vm50_vm0, %v45_v60, %v611_v59  ;;  %v25_v58 = vmul.f32 %v551_v11, %v609_v57 }
  0xfc   :  { %v57_v29 = vadd.f32 %v51_v24, %v23_v21  ;;  %v58_v12 = vadd.f32 %v52_v25, %v24_v22 }
  0xfe   :  { %v613_v62 = vpop.permute.xlu1 %48 }
  0xff   :  { %v615_v63 = vpop.permute.xlu0 %76 }
 0x102   :  { %v75_v0 = vpop.permute.xlu1 %74 }
 0x103   :  { %v103_v1 = vpop.permute.xlu0 %102  ;;  %v81_v27 = vsel %vm80_vm1, %v73_v61, %v75_v0  ;;  %v82_v28 = vsel %vm80_vm1, %v75_v0, %v615_v63  ;;  %v53_v0 = vsel %vm50_vm0, %v611_v59, %v613_v62 }
 0x104   :  { %v87_v32 = vadd.f32 %v81_v27, %v57_v29  ;;  %v88_v33 = vadd.f32 %v82_v28, %v58_v12 }
 0x106   :  { %v617_v2 = vpop.permute.xlu1 %78 }
 0x107   :  { %v619_v3 = vpop.permute.xlu0 %106 }
 0x10a   :  { %v105_v4 = vpop.permute.xlu1 %104 }
 0x10b   :  { %v133_v5 = vpop.permute.xlu0 %132  ;;  %v111_v16 = vsel %vm110_vm2, %v103_v1, %v105_v4  ;;  %v112_v31 = vsel %vm110_vm2, %v105_v4, %v619_v3  ;;  %v286_v1 = vlaneseq }
 0x10c   :  { %v117_v37 = vadd.f32 %v111_v16, %v87_v32  ;;  %v118_v38 = vadd.f32 %v112_v31, %v88_v33 }
 0x10e   :  { %v621_v6 = vpop.permute.xlu1 %108 }
 0x10f   :  { %v623_v7 = vpop.permute.xlu0 %136 }
 0x112   :  { %v135_v8 = vpop.permute.xlu1 %134 }
 0x113   :  { %v163_v9 = vpop.permute.xlu0 %162  ;;  %v141_v35 = vsel %vm140_vm3, %v133_v5, %v135_v8  ;;  %v142_v36 = vsel %vm140_vm3, %v135_v8, %v623_v7  ;;  %v83_v8 = vsel %vm80_vm1, %v615_v63, %v617_v2 }
 0x114   :  { %v147_v42 = vadd.f32 %v141_v35, %v117_v37  ;;  %v148_v43 = vadd.f32 %v142_v36, %v118_v38 }
 0x116   :  { %v625_v10 = vpop.permute.xlu1 %138 }
 0x117   :  { %v627_v14 = vpop.permute.xlu0 %166  ;;  %v143_v59 = vsel %vm140_vm3, %v623_v7, %v625_v10 }
 0x11a   :  { %v165_v13 = vpop.permute.xlu1 %164 }
 0x11b   :  { %v193_v17 = vpop.permute.xlu0 %192  ;;  %v171_v40 = vsel %vm170_vm4, %v163_v9, %v165_v13  ;;  %v172_v41 = vsel %vm170_vm4, %v165_v13, %v627_v14  ;;  %v59_v9 = vadd.f32 %v53_v0, %v25_v58  ;;  %v113_v13 = vsel %vm110_vm2, %v619_v3, %v621_v6 }
 0x11c   :  { %v177_v46 = vadd.f32 %v171_v40, %v147_v42  ;;  %v178_v47 = vadd.f32 %v172_v41, %v148_v43 }
 0x11d   :  { %v89_v11 = vadd.f32 %v83_v8, %v59_v9 }
 0x11e   :  { %v629_v15 = vpop.permute.xlu1 %168 }
 0x11f   :  { %v633_v20 = vpop.permute.xlu0 %196  ;;  %v119_v62 = vadd.f32 %v113_v13, %v89_v11  ;;  %v173_v63 = vsel %vm170_vm4, %v627_v14, %v629_v15 }
 0x121   :  { %v149_v21 = vadd.f32 %v143_v59, %v119_v62 }
 0x122   :  { %v195_v18 = vpop.permute.xlu1 %194 }
 0x123   :  { %v642_v26 = vpop.permute.xlu0 %226  ;;  %v201_v44 = vsel %vm200_vm5, %v193_v17, %v195_v18  ;;  %v202_v45 = vsel %vm200_vm5, %v195_v18, %v633_v20  ;;  %v287_v17 = vshrl.u32 %v286_v1, 7  ;;  %v179_v10 = vadd.f32 %v173_v63, %v149_v21 }
 0x124   :  { %v207_v52 = vadd.f32 %v201_v44, %v177_v46  ;;  %v208_v53 = vadd.f32 %v202_v45, %v178_v47 }
 0x125   :  { %v683_v2 = vsub.s32 0, %v287_v17  ;;  %v689_v6 = vsub.s32 4, %v287_v17  ;;  %v694_v24 = vsub.s32 1, %v287_v17  ;;  %v696_v7 = vsub.s32 5, %v287_v17 }
 0x126   :  { %v631_v19 = vpop.permute.xlu1 %198  ;;  %v698_v25 = vsub.s32 3, %v287_v17  ;;  %v702_v15 = vsub.s32 7, %v287_v17  ;;  %v706_v28 = vsub.s32 2, %v287_v17  ;;  %v728_v36 = vsub.s32 6, %v287_v17 }
 0x127   :  { %v253_v34 = vpop.permute.xlu0 %252 }
 0x12a   :  { %v223_v23 = vpop.permute.xlu1 %222 }
 0x12b   :  { %v257_v48 = vpop.permute.xlu0 %256 }
 0x12e   :  { %v225_v30 = vpop.permute.xlu1 %224 }
 0x12f   :  { %v231_v50 = vsel %vm230_vm6, %v223_v23, %v225_v30  ;;  %v232_v51 = vsel %vm230_vm6, %v225_v30, %v642_v26  ;;  %v203_v23 = vsel %vm200_vm5, %v633_v20, %v631_v19 }
 0x130   :  { %v237_v60 = vadd.f32 %v231_v50, %v207_v52  ;;  %v238_v61 = vadd.f32 %v232_v51, %v208_v53  ;;  %v209_v29 = vadd.f32 %v203_v23, %v179_v10 }
 0x132   :  { %v229_v39 = vpop.permute.xlu1 %228 }
 0x133   :  { %v233_v14 = vsel %vm230_vm6, %v642_v26, %v229_v39 }
 0x134   :  { %v239_v33 = vadd.f32 %v233_v14, %v209_v29 }
 0x136   :  { %v255_v49 = vpop.permute.xlu1 %254 }
 0x137   :  { %v261_v54 = vsel %vm260_vm7, %v253_v34, %v255_v49  ;;  %v262_v55 = vsel %vm260_vm7, %v255_v49, %v257_v48 }
 0x138   :  { %v267_v4 = vadd.f32 %v261_v54, %v237_v60  ;;  %v268_v5 = vadd.f32 %v262_v55, %v238_v61 }
 0x13a   :  { %v274_v57 = vadd.f32 %v607_v56, %v267_v4  ;;  %v275_v18 = vadd.f32 %v607_v56, %v268_v5 }
 0x13c   :  { %v685_v22 = vmax.f32 %v274_v57, 0.0  ;;  %v687_v3 = vmax.f32 %v275_v18, 0.0  ;;  %v708_v12 = vpop.permute.xlu0 %283 }
 0x13e   :  { %v289_v19 = vrot.slane %v685_v22, %v683_v2  ;;  %v293_v20 = vrot.slane %v687_v3, %v683_v2  ;;  %v383_v30 = vrot.slane %v685_v22, %v689_v6  ;;  %v387_v26 = vrot.slane %v687_v3, %v689_v6 }
 0x13f   :  { %v308_v16 = vrot.slane %v685_v22, %v694_v24  ;;  %v312_v31 = vrot.slane %v687_v3, %v694_v24  ;;  %v398_v32 = vrot.slane %v685_v22, %v696_v7  ;;  %v352_v34 = vrot.slane %v685_v22, %v698_v25 }
 0x140   :  { %v356_v35 = vrot.slane %v687_v3, %v698_v25  ;;  %v402_v39 = vrot.slane %v687_v3, %v696_v7  ;;  %v298_v42 = vmul.f32 %v289_v19, %v708_v12  ;;  %v299_v43 = vmul.f32 %v293_v20, %v708_v12 }
 0x141   :  { %v434_v44 = vrot.slane %v685_v22, %v702_v15  ;;  %v392_v46 = vmul.f32 %v383_v30, %v708_v12  ;;  %v393_v47 = vmul.f32 %v387_v26, %v708_v12  ;;  %v347_v51 = vpop.permute.xlu0 %346  ;;  %v330_v52 = vrot.slane %v685_v22, %v706_v28 }
 0x142   :  { %v334_v53 = vrot.slane %v687_v3, %v706_v28  ;;  %v416_v54 = vrot.slane %v685_v22, %v728_v36  ;;  %v361_v9 = vmul.f32 %v352_v34, %v347_v51  ;;  %v438_v13 = vrot.slane %v687_v3, %v702_v15 }
 0x143   :  { %v362_v57 = vmul.f32 %v356_v35, %v347_v51  ;;  %v443_v19 = vmul.f32 %v434_v44, %v347_v51 }
 0x144   :  { %v444_v20 = vmul.f32 %v438_v13, %v347_v51 }
 0x147   :  { %v704_v27 = vpop.permute.xlu1 %302 }
 0x148   :  { %v317_v37 = vmul.f32 %v308_v16, %v704_v27  ;;  %v318_v38 = vmul.f32 %v312_v31, %v704_v27  ;;  %v407_v40 = vmul.f32 %v398_v32, %v704_v27  ;;  %v408_v49 = vmul.f32 %v402_v39, %v704_v27 }
 0x14a   :  { %v320_v55 = vadd.f32 %v317_v37, %v298_v42  ;;  %v321_v58 = vadd.f32 %v318_v38, %v299_v43  ;;  %v410_v60 = vadd.f32 %v407_v40, %v392_v46  ;;  %v411_v17 = vadd.f32 %v408_v49, %v393_v47 }
 0x14b   :  { %v259_v41 = vpop.permute.xlu1 %258 }
 0x14c   :  { %v263_v45 = vsel %vm260_vm7, %v257_v48, %v259_v41  ;;  %v420_v48 = vrot.slane %v687_v3, %v728_v36 }
 0x14d   :  { %v269_v50 = vadd.f32 %v263_v45, %v239_v33 }
 0x14f   :  { %v276_v61 = vadd.f32 %v607_v56, %v269_v50  ;;  %v325_v0 = vpop.permute.xlu1 %324 }
 0x150   :  { %v339_v1 = vmul.f32 %v330_v52, %v325_v0  ;;  %v340_v4 = vmul.f32 %v334_v53, %v325_v0  ;;  %v425_v5 = vmul.f32 %v416_v54, %v325_v0  ;;  %v426_v8 = vmul.f32 %v420_v48, %v325_v0 }
 0x151   :  { %v279_v11 = vmax.f32 %v276_v61, 0.0 }
 0x152   :  { %v342_v18 = vadd.f32 %v339_v1, %v320_v55  ;;  %v343_v59 = vadd.f32 %v340_v4, %v321_v58  ;;  %v428_v62 = vadd.f32 %v425_v5, %v410_v60  ;;  %v429_v22 = vadd.f32 %v426_v8, %v411_v17 }
 0x153   :  { %v338_v63 = vrot.slane %v279_v11, %v706_v28  ;;  %v297_v21 = vrot.slane %v279_v11, %v683_v2  ;;  %v316_v56 = vrot.slane %v279_v11, %v694_v24  ;;  %v360_v10 = vrot.slane %v279_v11, %v698_v25 }
 0x154   :  { %v369_v23 = vpop.permute.xlu1 %368  ;;  %v364_v14 = vadd.f32 %v361_v9, %v342_v18  ;;  %v365_v29 = vadd.f32 %v362_v57, %v343_v59  ;;  %v391_v3 = vrot.slane %v279_v11, %v689_v6  ;;  %v424_v28 = vrot.slane %v279_v11, %v728_v36 }
 0x155   :  { %v300_v30 = vmul.f32 %v297_v21, %v708_v12  ;;  %v319_v26 = vmul.f32 %v316_v56, %v704_v27  ;;  %v341_v16 = vmul.f32 %v338_v63, %v325_v0  ;;  %v406_v25 = vrot.slane %v279_v11, %v696_v7 }
 0x156   :  { %v371_v2 = vadd.f32 %v369_v23, %v364_v14  ;;  %v372_v31 = vadd.f32 %v369_v23, %v365_v29  ;;  %v394_v32 = vmul.f32 %v391_v3, %v708_v12  ;;  %v446_v33 = vadd.f32 %v443_v19, %v428_v62 }
 0x157   :  { %v322_v24 = vadd.f32 %v319_v26, %v300_v30  ;;  %v363_v34 = vmul.f32 %v360_v10, %v347_v51  ;;  %v447_v37 = vadd.f32 %v444_v20, %v429_v22  ;;  %v409_v39 = vmul.f32 %v406_v25, %v704_v27 }
 0x158   :  { %v374_v35 = vmax.f32 %v371_v2, 0.0  ;;  %v375_v6 = vmax.f32 %v372_v31, 0.0  ;;  %v442_v40 = vrot.slane %v279_v11, %v702_v15  ;;  %v449_v41 = vadd.f32 %v446_v33, %v369_v23 }
 0x159   :  { %v344_v38 = vadd.f32 %v341_v16, %v322_v24  ;;  %v450_v7 = vadd.f32 %v447_v37, %v369_v23  ;;  %v427_v12 = vmul.f32 %v424_v28, %v325_v0  ;;  %v412_v42 = vadd.f32 %v409_v39, %v394_v32 }
 0x15a   :  { %377 = vst [vmem:[%s787_s3] sm:$0xf] %v374_v35  ;;  %378 = vst [vmem:[%s787_s3 + $0x8] sm:$0xf] %v375_v6  ;;  %v452_v43 = vmax.f32 %v449_v41, 0.0  ;;  %v445_v27 = vmul.f32 %v442_v40, %v347_v51 }
 0x15b   :  { %v366_v36 = vadd.f32 %v363_v34, %v344_v38  ;;  %v453_v44 = vmax.f32 %v450_v7, 0.0  ;;  %v430_v46 = vadd.f32 %v427_v12, %v412_v42 }
 0x15c   :  { %v458_v47 = vrot.slane %v452_v43, 4 }
 0x15d   :  { %v373_v45 = vadd.f32 %v369_v23, %v366_v36  ;;  %v459_v15 = vrot.slane %v453_v44, 4  ;;  %v448_v50 = vadd.f32 %v445_v27, %v430_v46 }
 0x15e   :  { %464 = vst [vmem:[%s787_s3] sm:$0xf0] %v458_v47 }
 0x15f   :  { %v376_v49 = vmax.f32 %v373_v45, 0.0  ;;  %465 = vst [vmem:[%s787_s3 + $0x8] sm:$0xf0] %v459_v15  ;;  %v451_v52 = vadd.f32 %v448_v50, %v369_v23 }
 0x161   :  { %379 = vst [vmem:[%s787_s3 + $0x10] sm:$0xf] %v376_v49  ;;  %v454_v53 = vmax.f32 %v451_v52, 0.0 }
 0x163   :  { %v460_v54 = vrot.slane %v454_v53, 4 }
 0x165   :  { %466 = vst [vmem:[%s787_s3 + $0x10] sm:$0xf0] %v460_v54 }

</bundles_post_ra>
